<compile_context>
chip_gen: v6e
topology: v6e:2x2x1
jax: 0.10.0
libtpu: 0.0.40
codegen_flags: <defaults>
</compile_context>

<pallas_src>
import functools

import jax
import jax.numpy as jnp
from jax import lax
from jax.experimental import pallas as pl
from jax.experimental.pallas import tpu as pltpu

EPS = 1e-7
TEMP = 0.1            # ConcreteDropout temperature
NEG_SLOPE = 0.01      # nn.LeakyReLU default negative slope
LANE = 128
ROW_ALIGN = 16        # bf16 sublane packing: keep batch tiles 16-row aligned


def _round_up(a, b):
    return ((a + b - 1) // b) * b


def _kernel(seed_ref, scal_ref, x_ref, w1_ref, b1_ref, w2_ref, out_ref, *, use_hw_prng):
    """One batch tile: ConcreteDropout -> Linear -> LeakyReLU, twice.

    scal_ref (SMEM f32[5]) = [p_logit1, p_logit2, 1/(1-p1), 1/(1-p2), b2].
    """
    tile_rows = x_ref.shape[0]
    step = pl.program_id(0)

    p_logit1 = scal_ref[0]
    p_logit2 = scal_ref[1]
    inv_retain1 = scal_ref[2]
    inv_retain2 = scal_ref[3]
    b2 = scal_ref[4]

    if use_hw_prng:
        # Hardware PRNG: bit generation comes off the VALU slot (previously the critical
        # path).  The grid step is mixed into the seed so every batch tile draws an
        # independent stream; the two dropout layers advance the same stream.
        pltpu.prng_seed(seed_ref[0], step)

        def uniform(shape, salt):
            del salt
            bits = pltpu.prng_random_bits(shape)
            bits = lax.bitcast_convert_type(bits, jnp.uint32)
            fbits = (bits >> 9) | jnp.uint32(0x3F800000)            # float in [1, 2)
            return lax.bitcast_convert_type(fbits, jnp.float32) - 1.0  # uniform [0, 1)
    else:
        # Interpret / non-TPU fallback: counter hash.  The iota counter base is built once
        # per shape and reused by both dropout layers; a single mix round.
        seed = seed_ref[0].astype(jnp.uint32)
        row_off = (step * tile_rows).astype(jnp.uint32)
        base_cache = {}

        def uniform(shape, salt):
            if shape not in base_cache:
                rows = lax.broadcasted_iota(jnp.int32, shape, 0).astype(jnp.uint32)
                cols = lax.broadcasted_iota(jnp.int32, shape, 1).astype(jnp.uint32)
                base_cache[shape] = ((rows + row_off) * jnp.uint32(0x9E3779B9)
                                     + cols * jnp.uint32(0x85EBCA6B) + seed)
            v = base_cache[shape] + jnp.uint32(salt * 0x68E31DA4)
            v = v ^ (v >> 16)
            v = v * jnp.uint32(0x7FEB352D)
            v = v ^ (v >> 15)
            v = v * jnp.uint32(0x846CA68B)
            v = v ^ (v >> 16)
            fbits = (v >> 9) | jnp.uint32(0x3F800000)
            return lax.bitcast_convert_type(fbits, jnp.float32) - 1.0

    def concrete_dropout(h, p_logit, inv_retain, salt):
        u = uniform(h.shape, salt)
        # log(u+eps) - log(1-u+eps) with a single log + approx (EUP) reciprocal.
        z = p_logit + jnp.log((u + EPS) * pl.reciprocal(1.0 - u + EPS, approx=True))
        keep = jax.nn.sigmoid(z * (-1.0 / TEMP))   # == 1 - sigmoid(z / TEMP)
        return h * (keep * inv_retain)             # scalar 1/(1-p), no per-element divide

    def leaky_relu(h):
        return jnp.where(h >= 0.0, h, NEG_SLOPE * h)

    x = x_ref[...].astype(jnp.float32)             # (tile_n, F)

    # Layer 1: dropout -> linear1 (bf16 MXU matmul, f32 accumulation) -> LeakyReLU.
    h = concrete_dropout(x, p_logit1, inv_retain1, 1)
    h = jnp.dot(h.astype(jnp.bfloat16), w1_ref[...],
                preferred_element_type=jnp.float32) + b1_ref[...]
    h = leaky_relu(h)                              # (tile_n, H_pad) f32

    # Layer 2: dropout -> linear2 (output width 1) -> LeakyReLU.
    # Contract against the w2 row with the batch rows landing on the *lane* axis, so the
    # tile writes back as one lane-dense (1, tile_n) row instead of tile_n single-lane
    # masked stores.  The MXU is otherwise idle here.
    h = concrete_dropout(h, p_logit2, inv_retain2, 2)
    out = lax.dot_general(w2_ref[...], h,
                          dimension_numbers=(((1,), (1,)), ((), ())),
                          preferred_element_type=jnp.float32)   # (1, tile_n)
    out = leaky_relu(out + b2)
    out_ref[...] = out.reshape(out_ref.shape).astype(out_ref.dtype)


def linear_embedding_forward(x, w1, b1, w2, b2, p_logits, seed, *, tile_n=2048, hw_prng=None):
    """Forward pass of LinearEmbedding.

    x: (N, in_features) f32; w1: (hidden, in); b1: (hidden,); w2: (1, hidden); b2: (1,);
    p_logits: (2,) ConcreteDropout logits.  Returns (N, 1) f32.
    """
    if hw_prng is None:
        hw_prng = jax.default_backend() == "tpu"

    N, F = x.shape
    H = w1.shape[0]
    # NOTE: round H to 256 on v6e/v7x once the hidden layer is big enough for the MXU to matter.
    H_pad = _round_up(H, LANE)

    # Batch tiling: 16-row aligned; keep >= 2 grid steps when the batch allows it so the
    # "parallel" axis covers both TensorCores on v7x.
    rows = _round_up(N, ROW_ALIGN)
    tile_n = max(ROW_ALIGN, min(_round_up(tile_n, ROW_ALIGN), rows))
    if tile_n == rows and rows >= 2 * ROW_ALIGN:
        tile_n = _round_up(rows // 2, ROW_ALIGN)
    n_pad = _round_up(rows, tile_n)
    num_tiles = n_pad // tile_n

    # x streamed unpadded (F is the full last dim, so the block is legal) and in bf16:
    # no wrapper-side 128-lane f32 padding pass, ~16x less HBM traffic for x.
    xb = x.astype(jnp.bfloat16)
    if n_pad != N:
        xb = jnp.pad(xb, ((0, n_pad - N), (0, 0)))

    # Weights: w1 pre-transposed to (F, H_pad) bf16; biases / w2 row-shaped f32, zero-padded
    # past H (zeros pass harmlessly through dropout / LeakyReLU / the final reduction).
    w1p = jnp.zeros((F, H_pad), jnp.bfloat16).at[:, :H].set(w1.T.astype(jnp.bfloat16))
    b1p = jnp.zeros((1, H_pad), jnp.float32).at[:, :H].set(b1.reshape(1, H).astype(jnp.float32))
    w2p = jnp.zeros((1, H_pad), jnp.float32).at[:, :H].set(w2.reshape(1, H).astype(jnp.float32))

    p_logits = jnp.asarray(p_logits, jnp.float32).reshape(2)
    inv_retain = 1.0 / (1.0 - jax.nn.sigmoid(p_logits))          # precomputed scalars
    scal = jnp.concatenate([p_logits, inv_retain,
                            jnp.asarray(b2, jnp.float32).reshape(1)])   # f32[5]
    seed_arr = jnp.asarray(seed, jnp.int32).reshape(1)

    # Resident weights: single-buffer w1 once it is actually large (v7x: 64 MiB VMEM) and
    # only then raise the scoped VMEM limit.  At demo sizes both stay at defaults.
    w1_bytes = F * H_pad * 2
    w1_kwargs = dict(pipeline_mode=pl.Buffered(1)) if w1_bytes > (4 << 20) else {}
    w1_spec = pl.BlockSpec((F, H_pad), lambda i: (0, 0), **w1_kwargs)
    vmem_est = (2 * tile_n * F * 2 + (1 if w1_kwargs else 2) * w1_bytes
                + 4 * H_pad * 4 + 2 * tile_n * 4
                + 6 * tile_n * max(F, H_pad) * 4)
    vmem_limit = int(min(64 << 20, 2 * vmem_est)) if vmem_est > (24 << 20) else None

    out = pl.pallas_call(
        functools.partial(_kernel, use_hw_prng=hw_prng),
        out_shape=jax.ShapeDtypeStruct((num_tiles, 1, tile_n), jnp.float32),
        grid=(num_tiles,),
        in_specs=[
            pl.BlockSpec(memory_space=pltpu.MemorySpace.SMEM),   # seed     (i32[1])
            pl.BlockSpec(memory_space=pltpu.MemorySpace.SMEM),   # scalars  (f32[5])
            pl.BlockSpec((tile_n, F), lambda i: (i, 0)),         # x tile   (pipelined)
            w1_spec,                                             # w1^T     (VMEM-resident)
            pl.BlockSpec((1, H_pad), lambda i: (0, 0)),          # b1       (resident)
            pl.BlockSpec((1, H_pad), lambda i: (0, 0)),          # w2 row   (resident)
        ],
        out_specs=pl.BlockSpec((1, 1, tile_n), lambda i: (i, 0, 0)),  # lane-dense row per tile
        compiler_params=pltpu.CompilerParams(
            dimension_semantics=("parallel",),                   # shard tiles across TCs on v7x
            vmem_limit_bytes=vmem_limit,
        ),
    )(seed_arr, scal, xb, w1p, b1p, w2p)

    return out.reshape(-1)[:N].reshape(N, 1)


if __name__ == "__main__":
    # Small shapes consistent with the module: (batch, in_features) -> (batch, 1).
    batch, in_features, hidden_features = 8, 16, 32

    key = jax.random.PRNGKey(0)
    kx, kw1, kb1, kw2, kb2, kbig = jax.random.split(key, 6)

    x = jax.random.normal(kx, (batch, in_features), dtype=jnp.float32)

    # Deterministic Linear-style init (uniform in +/- 1/sqrt(fan_in)).
    lim1 = 1.0 / float(jnp.sqrt(jnp.float32(in_features)))
    w1 = jax.random.uniform(kw1, (hidden_features, in_features), jnp.float32, -lim1, lim1)
    b1 = jax.random.uniform(kb1, (hidden_features,), jnp.float32, -lim1, lim1)

    lim2 = 1.0 / float(jnp.sqrt(jnp.float32(hidden_features)))
    w2 = jax.random.uniform(kw2, (1, hidden_features), jnp.float32, -lim2, lim2)
    b2 = jax.random.uniform(kb2, (1,), jnp.float32, -lim2, lim2)

    # ConcreteDropout p_logit initialised at p = 0.1 for both layers.
    p_init = 0.1
    p_logit = float(jnp.log(jnp.float32(p_init)) - jnp.log(jnp.float32(1.0 - p_init)))
    p_logits = jnp.array([p_logit, p_logit], dtype=jnp.float32)
    seed = 0

    out = jax.block_until_ready(
        linear_embedding_forward(x, w1, b1, w2, b2, p_logits, seed))
    assert out.shape == (batch, 1) and out.dtype == jnp.float32
    assert bool(jnp.all(jnp.isfinite(out)))

    # Sanity run at a larger batch: exercises the multi-step "parallel" grid, per-tile
    # hardware-PRNG seeding and the lane-dense output path.
    x_big = jax.random.normal(kbig, (512, in_features), dtype=jnp.float32)
    out_big = jax.block_until_ready(
        linear_embedding_forward(x_big, w1, b1, w2, b2, p_logits, seed))
    assert out_big.shape == (512, 1)
    assert bool(jnp.all(jnp.isfinite(out_big)))

    # TODO(synk): the ConcreteDropout KL/weight-regularisation terms (training-loss
    # side effects) are not part of forward()'s returned tensor and are omitted.
    print("KERNEL_OK")
</pallas_src>

<mosaic_0001>
module attributes {stable_mosaic.version = 11 : i64} {
  func.func @_kernel(%arg0: i32, %arg1: memref<1xi32, #tpu.memory_space<smem>>, %arg2: memref<5xf32, #tpu.memory_space<smem>>, %arg3: memref<16x16xbf16, #tpu.memory_space<vmem>>, %arg4: memref<16x128xbf16, #tpu.memory_space<vmem>>, %arg5: memref<1x128xf32, #tpu.memory_space<vmem>>, %arg6: memref<1x128xf32, #tpu.memory_space<vmem>>, %arg7: memref<1x1x16xf32, #tpu.memory_space<vmem>>) attributes {dimension_semantics = [#tpu.dimension_semantics<parallel>], iteration_bounds = array<i64: 1>, scalar_prefetch = 0 : i64, scratch_operands = 0 : i64, tpu.core_type = #tpu.core_type<tc>, window_params = [{transform_indices = @transform_0, window_bounds = array<i64: 1>}, {transform_indices = @transform_1, window_bounds = array<i64: 5>}, {transform_indices = @transform_2, window_bounds = array<i64: 16, 16>}, {pipeline_mode = #tpu.pipeline_mode<synchronous>, transform_indices = @transform_3, window_bounds = array<i64: 16, 128>}, {pipeline_mode = #tpu.pipeline_mode<synchronous>, transform_indices = @transform_4, window_bounds = array<i64: 1, 128>}, {pipeline_mode = #tpu.pipeline_mode<synchronous>, transform_indices = @transform_5, window_bounds = array<i64: 1, 128>}, {transform_indices = @transform_6, window_bounds = array<i64: 1, 1, 16>}]} {
    %c0 = arith.constant 0 : index
    %0 = memref.load %arg2[%c0] : memref<5xf32, #tpu.memory_space<smem>>
    %c1 = arith.constant 1 : index
    %1 = memref.load %arg2[%c1] : memref<5xf32, #tpu.memory_space<smem>>
    %c2 = arith.constant 2 : index
    %2 = memref.load %arg2[%c2] : memref<5xf32, #tpu.memory_space<smem>>
    %c3 = arith.constant 3 : index
    %3 = memref.load %arg2[%c3] : memref<5xf32, #tpu.memory_space<smem>>
    %c4 = arith.constant 4 : index
    %4 = memref.load %arg2[%c4] : memref<5xf32, #tpu.memory_space<smem>>
    %c0_0 = arith.constant 0 : index
    %5 = memref.load %arg1[%c0_0] : memref<1xi32, #tpu.memory_space<smem>>
    %c16_i32 = arith.constant 16 : i32
    %6 = arith.muli %arg0, %c16_i32 : i32
    %c0_1 = arith.constant 0 : index
    %c0_2 = arith.constant 0 : index
    %7 = vector.load %arg3[%c0_1, %c0_2] : memref<16x16xbf16, #tpu.memory_space<vmem>>, vector<16x16xbf16>
    %8 = arith.extf %7 : vector<16x16xbf16> to vector<16x16xf32>
    %9 = tpu.iota {dimensions = array<i32: 0>} : vector<16x16xi32>
    %10 = tpu.iota {dimensions = array<i32: 1>} : vector<16x16xi32>
    %11 = vector.broadcast %6 : i32 to vector<16x16xi32>
    %12 = arith.addi %9, %11 : vector<16x16xi32>
    %c-1640531527_i32 = arith.constant -1640531527 : i32
    %13 = vector.broadcast %c-1640531527_i32 : i32 to vector<16x16xi32>
    %14 = arith.muli %12, %13 : vector<16x16xi32>
    %c-2048144789_i32 = arith.constant -2048144789 : i32
    %15 = vector.broadcast %c-2048144789_i32 : i32 to vector<16x16xi32>
    %16 = arith.muli %10, %15 : vector<16x16xi32>
    %17 = arith.addi %14, %16 : vector<16x16xi32>
    %18 = vector.broadcast %5 : i32 to vector<16x16xi32>
    %19 = arith.addi %17, %18 : vector<16x16xi32>
    %c1759714724_i32 = arith.constant 1759714724 : i32
    %20 = vector.broadcast %c1759714724_i32 : i32 to vector<16x16xi32>
    %21 = arith.addi %19, %20 : vector<16x16xi32>
    %c16_i32_3 = arith.constant 16 : i32
    %22 = vector.broadcast %c16_i32_3 : i32 to vector<16x16xi32>
    %23 = arith.shrui %21, %22 : vector<16x16xi32>
    %24 = arith.xori %21, %23 : vector<16x16xi32>
    %c2146121005_i32 = arith.constant 2146121005 : i32
    %25 = vector.broadcast %c2146121005_i32 : i32 to vector<16x16xi32>
    %26 = arith.muli %24, %25 : vector<16x16xi32>
    %c15_i32 = arith.constant 15 : i32
    %27 = vector.broadcast %c15_i32 : i32 to vector<16x16xi32>
    %28 = arith.shrui %26, %27 : vector<16x16xi32>
    %29 = arith.xori %26, %28 : vector<16x16xi32>
    %c-2073254261_i32 = arith.constant -2073254261 : i32
    %30 = vector.broadcast %c-2073254261_i32 : i32 to vector<16x16xi32>
    %31 = arith.muli %29, %30 : vector<16x16xi32>
    %c16_i32_4 = arith.constant 16 : i32
    %32 = vector.broadcast %c16_i32_4 : i32 to vector<16x16xi32>
    %33 = arith.shrui %31, %32 : vector<16x16xi32>
    %34 = arith.xori %31, %33 : vector<16x16xi32>
    %c9_i32 = arith.constant 9 : i32
    %35 = vector.broadcast %c9_i32 : i32 to vector<16x16xi32>
    %36 = arith.shrui %34, %35 : vector<16x16xi32>
    %c1065353216_i32 = arith.constant 1065353216 : i32
    %37 = vector.broadcast %c1065353216_i32 : i32 to vector<16x16xi32>
    %38 = arith.ori %36, %37 : vector<16x16xi32>
    %39 = tpu.bitcast %38 : vector<16x16xi32> -> vector<16x16xf32>
    %cst = arith.constant 1.000000e+00 : f32
    %40 = vector.broadcast %cst : f32 to vector<16x16xf32>
    %41 = arith.subf %39, %40 : vector<16x16xf32>
    %cst_5 = arith.constant 1.000000e-07 : f32
    %42 = vector.broadcast %cst_5 : f32 to vector<16x16xf32>
    %43 = arith.addf %41, %42 : vector<16x16xf32>
    %cst_6 = arith.constant 1.000000e+00 : f32
    %44 = vector.broadcast %cst_6 : f32 to vector<16x16xf32>
    %45 = arith.subf %44, %41 : vector<16x16xf32>
    %cst_7 = arith.constant 1.000000e-07 : f32
    %46 = vector.broadcast %cst_7 : f32 to vector<16x16xf32>
    %47 = arith.addf %45, %46 : vector<16x16xf32>
    %48 = tpu.reciprocal %47 {approx = true} : vector<16x16xf32> -> vector<16x16xf32>
    %49 = arith.mulf %43, %48 : vector<16x16xf32>
    %50 = math.log %49 : vector<16x16xf32>
    %51 = vector.broadcast %0 : f32 to vector<16x16xf32>
    %52 = arith.addf %51, %50 : vector<16x16xf32>
    %cst_8 = arith.constant -1.000000e+01 : f32
    %53 = vector.broadcast %cst_8 : f32 to vector<16x16xf32>
    %54 = arith.mulf %52, %53 : vector<16x16xf32>
    %55 = arith.negf %54 : vector<16x16xf32>
    %56 = math.exp %55 : vector<16x16xf32>
    %cst_9 = arith.constant 1.000000e+00 : f32
    %57 = vector.broadcast %cst_9 : f32 to vector<16x16xf32>
    %58 = arith.addf %57, %56 : vector<16x16xf32>
    %59 = arith.divf %57, %58 : vector<16x16xf32>
    %60 = vector.broadcast %2 : f32 to vector<16x16xf32>
    %61 = arith.mulf %59, %60 : vector<16x16xf32>
    %62 = arith.mulf %8, %61 : vector<16x16xf32>
    %63 = arith.truncf %62 : vector<16x16xf32> to vector<16x16xbf16>
    %c0_10 = arith.constant 0 : index
    %c0_11 = arith.constant 0 : index
    %64 = vector.load %arg4[%c0_10, %c0_11] : memref<16x128xbf16, #tpu.memory_space<vmem>>, vector<16x128xbf16>
    %cst_12 = arith.constant dense<0.000000e+00> : vector<16x128xf32>
    %65 = tpu.matmul %63, %64, %cst_12 {dimension_numbers = #tpu.dot_dimension_numbers<[1], [0], [0], [1], [0, 0, 1, 1], [], []>} : vector<16x16xbf16>, vector<16x128xbf16>, vector<16x128xf32> -> vector<16x128xf32>
    %c0_13 = arith.constant 0 : index
    %c0_14 = arith.constant 0 : index
    %66 = vector.load %arg5[%c0_13, %c0_14] : memref<1x128xf32, #tpu.memory_space<vmem>>, vector<1x128xf32>
    %67 = vector.broadcast %66 : vector<1x128xf32> to vector<16x128xf32>
    %68 = arith.addf %65, %67 : vector<16x128xf32>
    %cst_15 = arith.constant 0.000000e+00 : f32
    %69 = vector.broadcast %cst_15 : f32 to vector<16x128xf32>
    %70 = arith.cmpf oge, %68, %69 : vector<16x128xf32>
    %cst_16 = arith.constant 0.00999999977 : f32
    %71 = vector.broadcast %cst_16 : f32 to vector<16x128xf32>
    %72 = arith.mulf %71, %68 : vector<16x128xf32>
    %73 = arith.select %70, %68, %72 : vector<16x128xi1>, vector<16x128xf32>
    %74 = tpu.iota {dimensions = array<i32: 0>} : vector<16x128xi32>
    %75 = tpu.iota {dimensions = array<i32: 1>} : vector<16x128xi32>
    %76 = vector.broadcast %6 : i32 to vector<16x128xi32>
    %77 = arith.addi %74, %76 : vector<16x128xi32>
    %c-1640531527_i32_17 = arith.constant -1640531527 : i32
    %78 = vector.broadcast %c-1640531527_i32_17 : i32 to vector<16x128xi32>
    %79 = arith.muli %77, %78 : vector<16x128xi32>
    %c-2048144789_i32_18 = arith.constant -2048144789 : i32
    %80 = vector.broadcast %c-2048144789_i32_18 : i32 to vector<16x128xi32>
    %81 = arith.muli %75, %80 : vector<16x128xi32>
    %82 = arith.addi %79, %81 : vector<16x128xi32>
    %83 = vector.broadcast %5 : i32 to vector<16x128xi32>
    %84 = arith.addi %82, %83 : vector<16x128xi32>
    %c-775537848_i32 = arith.constant -775537848 : i32
    %85 = vector.broadcast %c-775537848_i32 : i32 to vector<16x128xi32>
    %86 = arith.addi %84, %85 : vector<16x128xi32>
    %c16_i32_19 = arith.constant 16 : i32
    %87 = vector.broadcast %c16_i32_19 : i32 to vector<16x128xi32>
    %88 = arith.shrui %86, %87 : vector<16x128xi32>
    %89 = arith.xori %86, %88 : vector<16x128xi32>
    %c2146121005_i32_20 = arith.constant 2146121005 : i32
    %90 = vector.broadcast %c2146121005_i32_20 : i32 to vector<16x128xi32>
    %91 = arith.muli %89, %90 : vector<16x128xi32>
    %c15_i32_21 = arith.constant 15 : i32
    %92 = vector.broadcast %c15_i32_21 : i32 to vector<16x128xi32>
    %93 = arith.shrui %91, %92 : vector<16x128xi32>
    %94 = arith.xori %91, %93 : vector<16x128xi32>
    %c-2073254261_i32_22 = arith.constant -2073254261 : i32
    %95 = vector.broadcast %c-2073254261_i32_22 : i32 to vector<16x128xi32>
    %96 = arith.muli %94, %95 : vector<16x128xi32>
    %c16_i32_23 = arith.constant 16 : i32
    %97 = vector.broadcast %c16_i32_23 : i32 to vector<16x128xi32>
    %98 = arith.shrui %96, %97 : vector<16x128xi32>
    %99 = arith.xori %96, %98 : vector<16x128xi32>
    %c9_i32_24 = arith.constant 9 : i32
    %100 = vector.broadcast %c9_i32_24 : i32 to vector<16x128xi32>
    %101 = arith.shrui %99, %100 : vector<16x128xi32>
    %c1065353216_i32_25 = arith.constant 1065353216 : i32
    %102 = vector.broadcast %c1065353216_i32_25 : i32 to vector<16x128xi32>
    %103 = arith.ori %101, %102 : vector<16x128xi32>
    %104 = tpu.bitcast %103 : vector<16x128xi32> -> vector<16x128xf32>
    %cst_26 = arith.constant 1.000000e+00 : f32
    %105 = vector.broadcast %cst_26 : f32 to vector<16x128xf32>
    %106 = arith.subf %104, %105 : vector<16x128xf32>
    %cst_27 = arith.constant 1.000000e-07 : f32
    %107 = vector.broadcast %cst_27 : f32 to vector<16x128xf32>
    %108 = arith.addf %106, %107 : vector<16x128xf32>
    %cst_28 = arith.constant 1.000000e+00 : f32
    %109 = vector.broadcast %cst_28 : f32 to vector<16x128xf32>
    %110 = arith.subf %109, %106 : vector<16x128xf32>
    %cst_29 = arith.constant 1.000000e-07 : f32
    %111 = vector.broadcast %cst_29 : f32 to vector<16x128xf32>
    %112 = arith.addf %110, %111 : vector<16x128xf32>
    %113 = tpu.reciprocal %112 {approx = true} : vector<16x128xf32> -> vector<16x128xf32>
    %114 = arith.mulf %108, %113 : vector<16x128xf32>
    %115 = math.log %114 : vector<16x128xf32>
    %116 = vector.broadcast %1 : f32 to vector<16x128xf32>
    %117 = arith.addf %116, %115 : vector<16x128xf32>
    %cst_30 = arith.constant -1.000000e+01 : f32
    %118 = vector.broadcast %cst_30 : f32 to vector<16x128xf32>
    %119 = arith.mulf %117, %118 : vector<16x128xf32>
    %120 = arith.negf %119 : vector<16x128xf32>
    %121 = math.exp %120 : vector<16x128xf32>
    %cst_31 = arith.constant 1.000000e+00 : f32
    %122 = vector.broadcast %cst_31 : f32 to vector<16x128xf32>
    %123 = arith.addf %122, %121 : vector<16x128xf32>
    %124 = arith.divf %122, %123 : vector<16x128xf32>
    %125 = vector.broadcast %3 : f32 to vector<16x128xf32>
    %126 = arith.mulf %124, %125 : vector<16x128xf32>
    %127 = arith.mulf %73, %126 : vector<16x128xf32>
    %c0_32 = arith.constant 0 : index
    %c0_33 = arith.constant 0 : index
    %128 = vector.load %arg6[%c0_32, %c0_33] : memref<1x128xf32, #tpu.memory_space<vmem>>, vector<1x128xf32>
    %cst_34 = arith.constant dense<0.000000e+00> : vector<1x16xf32>
    %129 = tpu.matmul %128, %127, %cst_34 {dimension_numbers = #tpu.dot_dimension_numbers<[1], [1], [0], [0], [0, 0, 1, 0], [], []>} : vector<1x128xf32>, vector<16x128xf32>, vector<1x16xf32> -> vector<1x16xf32>
    %130 = vector.broadcast %4 : f32 to vector<1x16xf32>
    %131 = arith.addf %129, %130 : vector<1x16xf32>
    %cst_35 = arith.constant 0.000000e+00 : f32
    %132 = vector.broadcast %cst_35 : f32 to vector<1x16xf32>
    %133 = arith.cmpf oge, %131, %132 : vector<1x16xf32>
    %cst_36 = arith.constant 0.00999999977 : f32
    %134 = vector.broadcast %cst_36 : f32 to vector<1x16xf32>
    %135 = arith.mulf %134, %131 : vector<1x16xf32>
    %136 = arith.select %133, %131, %135 : vector<1x16xi1>, vector<1x16xf32>
    %137 = vector.shape_cast %136 : vector<1x16xf32> to vector<1x1x16xf32>
    %c0_37 = arith.constant 0 : index
    %c0_38 = arith.constant 0 : index
    %c0_39 = arith.constant 0 : index
    %138 = vector.load %arg7[%c0_37, %c0_38, %c0_39] : memref<1x1x16xf32, #tpu.memory_space<vmem>>, vector<1x1x16xf32>
    tpu.vector_store %arg7[%c0_37, %c0_38, %c0_39], %137 {strides = array<i32>} : memref<1x1x16xf32, #tpu.memory_space<vmem>>, vector<1x1x16xf32>,
    return
  }
  func.func @transform_0(%arg0: i32) -> i32 {
    %c0_i32 = arith.constant 0 : i32
    %c0_i32_0 = arith.constant 0 : i32
    return %c0_i32 : i32
  }
  func.func @transform_1(%arg0: i32) -> i32 {
    %c0_i32 = arith.constant 0 : i32
    %c0_i32_0 = arith.constant 0 : i32
    return %c0_i32 : i32
  }
  func.func @transform_2(%arg0: i32) -> (i32, i32) {
    %c0_i32 = arith.constant 0 : i32
    %c0_i32_0 = arith.constant 0 : i32
    return %arg0, %c0_i32 : i32, i32
  }
  func.func @transform_3(%arg0: i32) -> (i32, i32) {
    %c0_i32 = arith.constant 0 : i32
    %c0_i32_0 = arith.constant 0 : i32
    %c0_i32_1 = arith.constant 0 : i32
    return %c0_i32, %c0_i32_0 : i32, i32
  }
  func.func @transform_4(%arg0: i32) -> (i32, i32) {
    %c0_i32 = arith.constant 0 : i32
    %c0_i32_0 = arith.constant 0 : i32
    %c0_i32_1 = arith.constant 0 : i32
    return %c0_i32, %c0_i32_0 : i32, i32
  }
  func.func @transform_5(%arg0: i32) -> (i32, i32) {
    %c0_i32 = arith.constant 0 : i32
    %c0_i32_0 = arith.constant 0 : i32
    %c0_i32_1 = arith.constant 0 : i32
    return %c0_i32, %c0_i32_0 : i32, i32
  }
  func.func @transform_6(%arg0: i32) -> (i32, i32, i32) {
    %c0_i32 = arith.constant 0 : i32
    %c0_i32_0 = arith.constant 0 : i32
    %c0_i32_1 = arith.constant 0 : i32
    return %arg0, %c0_i32, %c0_i32_0 : i32, i32, i32
  }
}

</mosaic_0001>

<bundles_post_ra>
// kernel: tpu_custom_call.1
= control target key start
LH: loop header
LB: loop body
LE: loop exit
PB: predicated region body
PF: predicated region fallthrough
CT: control target
= control target key end

     0   :  { %12 = vsyncpa [#allocation6], 0  ;;  %s614_s0 = inlined_call_operand.<no memory space> [shape: s32[1], index: 0, kind: input, shape index: {}]   ;;  %s615_s1 = inlined_call_operand.vmem [shape: f32[5], index: 1, kind: input, shape index: {}]   ;;  %s616_s2 = inlined_call_operand.hbm [shape: bf16[16,16], index: 2, kind: input, shape index: {}]   ;;  %s617_s3 = inlined_call_operand.hbm [shape: bf16[16,128], index: 3, kind: input, shape index: {}]   ;;  %s618_s4 = inlined_call_operand.vmem [shape: f32[1,128], index: 4, kind: input, shape index: {}]   ;;  %s619_s5 = inlined_call_operand.vmem [shape: f32[1,128], index: 5, kind: input, shape index: {}]   ;;  %s620_s6 = inlined_call_operand.hbm [shape: f32[1,1,16], index: 6, kind: output, shape index: {}]  }
   0x1   :  { %13 = vsyncpa [#allocation4], 0 }
   0x2   :  { %14 = vsyncpa [#allocation9], 0 }
   0x3   :  { %15 = vsyncpa [#allocation5], 0  ;;  %s24_s23 = sshll.u32 %s615_s1, 4  ;;  %s25_s23 = int_to_ptr.vmem [resolvable:$true] %s24_s23 }
   0x4   :  { %s457_s24 = scalar_lea.vmem %s25_s23, 16  ;;  %p462_p1 = scmp.lt.s32.totalorder %s25_s23, %s25_s23 }
   0x5   :  { %p458_p0 = scmp.ne.s32.totalorder %s25_s23, %s457_s24  ;;  %p463_p2 = scmp.lt.s32.totalorder %s457_s24, %s457_s24 }
   0x7   :  { %p464_p3 = por %p463_p2, %p462_p1 }
   0x9   :  { %p465_p4 = pnand %p464_p3, %p458_p0 }
   0xb   :  { %468 = shalt.err (!%p465_p4)
}
   0xc   :  { %s537_s25 = smov [#allocation3]   ;;  %s538_s26 = smov [#allocation7]  }
   0xd   :  { %27 = dma.vmem_to_smem %s25_s23, 16, %s537_s25, [#allocation6]  }
   0xe   :  { %s33_s27 = sshll.u32 %s538_s26, 4  ;;  %s34_s27 = int_to_ptr.vmem [resolvable:$true] %s33_s27 }
   0xf   :  { %s477_s28 = scalar_lea.vmem %s34_s27, 128  ;;  %p482_p6 = scmp.lt.s32.totalorder %s34_s27, %s34_s27 }
  0x10   :  { %p478_p5 = scmp.ne.s32.totalorder %s34_s27, %s477_s28  ;;  %p483_p7 = scmp.lt.s32.totalorder %s477_s28, %s477_s28 }
  0x12   :  { %p484_p8 = por %p483_p7, %p482_p6 }
  0x14   :  { %p485_p9 = pnand %p484_p8, %p478_p5 }
  0x16   :  { %488 = shalt.err (!%p485_p9)
}
  0x17   :  { %s539_s1 = smov 64   ;;  %s540_s29 = smov 4  }
  0x18   :  { %39 = dma.hbm_to_vmem [thread:$0]  %s616_s2, 128, %s34_s27, [#allocation4], %s539_s1, %s539_s1, %s540_s29  }
  0x19   :  { %s541_s8 = smov [#allocation8]  }
  0x1a   :  { %s45_s9 = sshll.u32 %s541_s8, 4  ;;  %s46_s9 = int_to_ptr.vmem [resolvable:$true] %s45_s9 }
  0x1b   :  { %s497_s10 = scalar_lea.vmem %s46_s9, 128  ;;  %p502_p11 = scmp.lt.s32.totalorder %s46_s9, %s46_s9 }
  0x1c   :  { %p498_p10 = scmp.ne.s32.totalorder %s46_s9, %s497_s10  ;;  %p503_p12 = scmp.lt.s32.totalorder %s497_s10, %s497_s10 }
  0x1e   :  { %p504_p13 = por %p503_p12, %p502_p11 }
  0x20   :  { %p505_p0 = pnand %p504_p13, %p498_p10 }
  0x22   :  { %508 = shalt.err (!%p505_p0)
}
  0x23   :  { %51 = dma.hbm_to_vmem [thread:$0]  %s617_s3, 128, %s46_s9, [#allocation9], %s539_s1, %s539_s1, %s540_s29  }
  0x24   :  { %529 = dma.done.wait [#allocation6], 16  }
  0x25   :  { %530 = vsyncadd [#allocation6], 4294967280 }
  0x26   :  { %531 = dma.done.wait [#allocation4], 128  }
  0x27   :  { %532 = vsyncadd [#allocation4], 4294967168 }
  0x28   :  { %533 = dma.done.wait [#allocation9], 128  }
  0x29   :  { %534 = vsyncadd [#allocation9], 4294967168 }
  0x2a   :  { %65 = sfence }
  0x2b   :  { %v424_v0 = vld [vmem:[#allocation8] sm:$0xff]   ;;  %v78_v1 = vlaneseq  ;;  %v542_v2 = vmov 0.0   ;;  %vm543_vm0 = vmmov 0   ;;  %v91_v8 = vstv %s614_s0  ;;  %s67_s0 = sld [smem:[#allocation3]]  ;;  %v395_v63 = vld [vmem:[#allocation7] sm:$0xff]   ;;  %s544_s20 = smov [#allocation10]  }
  0x2c   :  { %403 = vmatprep.subr.bf16.mxu0 %v542_v2  ;;  %409 = vmatprep.subr.mxu1 %v542_v2  ;;  %s380_s13 = sld [smem:[#allocation3 + $0x2]]  ;;  %vm172_vm1 = vcmask 130048   ;;  %s368_s21 = sshll.u32 %s544_s20, 4  ;;  %vm360_vm5 = vcmask 122880   ;;  %s369_s21 = int_to_ptr.vmem [resolvable:$true] %s368_s21 }
  0x2d   :  { %404 = vmatpush3.bf16.msra.mxu0 %v424_v0  ;;  %405 = vmatprep.mubr.msk.bf16.mxu0 %vm543_vm0, %v542_v2  ;;  %v79_v3 = vshrl.u32 %v78_v1, 7  ;;  %v82_v4 = vand.u32 127, %v78_v1  ;;  %v396_v1 = vunpack.c.l.bf16 %v395_v63  ;;  %s379_s14 = sld [smem:[#allocation3 + $0x1]]  ;;  %s509_s22 = scalar_lea.vmem %s369_s21, 16 }
  0x2e   :  { %413 = vmatprep.mubr.msk.f32.mxu1 %vm543_vm0, %v542_v2  ;;  %s381_s15 = sld [smem:[#allocation3 + $0x3]]  ;;  %p510_p1 = scmp.ne.s32.totalorder %s369_s21, %s509_s22 }
  0x2f   :  { %v80_v5 = vadd.s32 8, %v79_v3  ;;  %v86_v6 = vmul.u32 2654435769, %v79_v3  ;;  %v88_v7 = vmul.u32 2246822507, %v82_v4  ;;  %v397_v4 = vunpack.c.h.bf16 %v395_v63  ;;  %s382_s19 = sld [smem:[#allocation3 + $0x4]]  ;;  %p514_p2 = scmp.lt.s32.totalorder %s369_s21, %s369_s21 }
  0x30   :  { %s513_s23 = scalar_lea.vmem %s369_s21, 32 }
  0x31   :  { %v87_v9 = vmul.u32 2654435769, %v80_v5  ;;  %v89_v10 = vadd.s32 %v88_v7, %v86_v6  ;;  %v134_v49 = vstv %s67_s0  ;;  %p515_p3 = scmp.lt.s32.totalorder %s513_s23, %s509_s22 }
  0x32   :  { %v151_v0 = vstv %s380_s13 }
  0x33   :  { %v90_v11 = vadd.s32 %v88_v7, %v87_v9  ;;  %v596_v12 = vadd.s32 %v91_v8, %v89_v10  ;;  %p516_p4 = por %p515_p3, %p514_p2 }
  0x35   :  { %v598_v13 = vadd.s32 %v91_v8, %v90_v11  ;;  %v94_v14 = vadd.s32 1759714724, %v596_v12  ;;  %p517_p5 = pnand %p516_p4, %p510_p1 }
  0x37   :  { %v95_v15 = vadd.s32 1759714724, %v598_v13  ;;  %v96_v16 = vshrl.u32 %v94_v14, 16  ;;  %v224_v11 = vadd.s32 3519429448, %v598_v13 }
  0x39   :  { %v97_v17 = vshrl.u32 %v95_v15, 16  ;;  %v98_v18 = vxor.u32 %v96_v16, %v94_v14  ;;  %v223_v14 = vadd.s32 3519429448, %v596_v12 }
  0x3b   :  { %v99_v19 = vxor.u32 %v97_v17, %v95_v15  ;;  %v100_v20 = vmul.u32 2146121005, %v98_v18  ;;  %v226_v15 = vshrl.u32 %v224_v11, 16  ;;  %v225_v16 = vshrl.u32 %v223_v14, 16 }
  0x3d   :  { %v101_v21 = vmul.u32 2146121005, %v99_v19  ;;  %v102_v22 = vshrl.u32 %v100_v20, 15  ;;  %v228_v17 = vxor.u32 %v226_v15, %v224_v11  ;;  %v227_v18 = vxor.u32 %v225_v16, %v223_v14 }
  0x3f   :  { %v103_v23 = vshrl.u32 %v101_v21, 15  ;;  %v104_v24 = vxor.u32 %v102_v22, %v100_v20  ;;  %v230_v19 = vmul.u32 2146121005, %v228_v17  ;;  %v229_v20 = vmul.u32 2146121005, %v227_v18 }
  0x40   :  { %v285_v17 = vld [vmem:[%s619_s5] sm:$0x1]  ;;  %v286_v18 = vstv %s382_s19 }
  0x41   :  { %v105_v25 = vxor.u32 %v103_v23, %v101_v21  ;;  %v106_v26 = vmul.u32 2221713035, %v104_v24  ;;  %v232_v21 = vshrl.u32 %v230_v19, 15  ;;  %v231_v22 = vshrl.u32 %v229_v20, 15 }
  0x43   :  { %v107_v27 = vmul.u32 2221713035, %v105_v25  ;;  %v108_v28 = vshrl.u32 %v106_v26, 16  ;;  %v234_v23 = vxor.u32 %v232_v21, %v230_v19  ;;  %v233_v24 = vxor.u32 %v231_v22, %v229_v20 }
  0x45   :  { %v109_v29 = vshrl.u32 %v107_v27, 16  ;;  %v110_v30 = vxor.u32 %v108_v28, %v106_v26  ;;  %v236_v25 = vmul.u32 2221713035, %v234_v23  ;;  %v235_v26 = vmul.u32 2221713035, %v233_v24 }
  0x47   :  { %v111_v31 = vxor.u32 %v109_v29, %v107_v27  ;;  %v112_v32 = vshrl.u32 %v110_v30, 9  ;;  %v238_v27 = vshrl.u32 %v236_v25, 16  ;;  %v237_v28 = vshrl.u32 %v235_v26, 16 }
  0x49   :  { %v113_v33 = vshrl.u32 %v111_v31, 9  ;;  %v114_v34 = vor.u32 1065353216, %v112_v32  ;;  %v240_v29 = vxor.u32 %v238_v27, %v236_v25  ;;  %v239_v30 = vxor.u32 %v237_v28, %v235_v26 }
  0x4b   :  { %v115_v35 = vor.u32 1065353216, %v113_v33  ;;  %v383_v36 = vadd.f32 -1.0, %v114_v34  ;;  %v242_v31 = vshrl.u32 %v240_v29, 9  ;;  %v241_v13 = vshrl.u32 %v239_v30, 9 }
  0x4d   :  { %v384_v37 = vadd.f32 -1.0, %v115_v35  ;;  %v122_v38 = vsub.f32 1.0, %v383_v36  ;;  %v120_v42 = vadd.f32 1e-07, %v383_v36  ;;  %v244_v32 = vor.u32 1065353216, %v242_v31 }
  0x4e   :  { %v243_v12 = vor.u32 1065353216, %v241_v13 }
  0x4f   :  { %v123_v39 = vsub.f32 1.0, %v384_v37  ;;  %v124_v40 = vadd.f32 1e-07, %v122_v38  ;;  %v121_v43 = vadd.f32 1e-07, %v384_v37  ;;  %v391_v33 = vadd.f32 -1.0, %v244_v32 }
  0x50   :  { %v390_v34 = vadd.f32 -1.0, %v243_v12 }
  0x51   :  { %v125_v41 = vadd.f32 1e-07, %v123_v39  ;;  %425 = vrcp.f32 %v124_v40  ;;  %v252_v35 = vsub.f32 1.0, %v391_v33  ;;  %v250_v39 = vadd.f32 1e-07, %v391_v33 }
  0x52   :  { %v251_v36 = vsub.f32 1.0, %v390_v34 }
  0x53   :  { %427 = vrcp.f32 %v125_v41  ;;  %v254_v37 = vadd.f32 1e-07, %v252_v35  ;;  %v249_v41 = vadd.f32 1e-07, %v390_v34 }
  0x54   :  { %v253_v38 = vadd.f32 1e-07, %v251_v36 }
  0x5e   :  { %v426_v44 = vpop.eup %425 }
  0x5f   :  { %v128_v45 = vmul.f32 %v426_v44, %v120_v42 }
  0x60   :  { %v428_v46 = vpop.eup %427 }
  0x61   :  { %v129_v47 = vmul.f32 %v428_v46, %v121_v43  ;;  %429 = vlog2.f32 %v128_v45 }
  0x63   :  { %431 = vlog2.f32 %v129_v47 }
  0x6e   :  { %v430_v48 = vpop.eup %429 }
  0x6f   :  { %v131_v50 = vmul.f32 0.6931472, %v430_v48  ;;  %v263_v48 = vstv %s379_s14 }
  0x70   :  { %v432_v51 = vpop.eup %431 }
  0x71   :  { %v133_v52 = vmul.f32 0.6931472, %v432_v51  ;;  %v135_v53 = vadd.f32 %v134_v49, %v131_v50 }
  0x73   :  { %v136_v54 = vadd.f32 %v134_v49, %v133_v52  ;;  %v385_v55 = vmul.f32 10.0, %v135_v53 }
  0x75   :  { %v386_v56 = vmul.f32 10.0, %v136_v54  ;;  %v141_v57 = vmul.f32 1.442695, %v385_v55 }
  0x77   :  { %433 = vpow2.f32 %v141_v57  ;;  %v143_v58 = vmul.f32 1.442695, %v386_v56 }
  0x79   :  { %435 = vpow2.f32 %v143_v58 }
  0x84   :  { %v434_v59 = vpop.eup %433 }
  0x85   :  { %v145_v60 = vadd.f32 1.0, %v434_v59 }
  0x86   :  { %v436_v61 = vpop.eup %435 }
  0x87   :  { %v146_v62 = vadd.f32 1.0, %v436_v61  ;;  %437 = vrcp.f32 %v145_v60  ;;  %v387_v60 = vld [vmem:[%s618_s4] ss:$0 sm:$0xff] }
  0x89   :  { %439 = vrcp.f32 %v146_v62 }
  0x8a   :  { %441 = vrcp.f32 %v254_v37 }
  0x8b   :  { %443 = vrcp.f32 %v253_v38 }
  0x94   :  { %v438_v3 = vpop.eup %437 }
  0x95   :  { %v152_v5 = vmul.f32 %v438_v3, %v151_v0 }
  0x96   :  { %v440_v6 = vpop.eup %439 }
  0x97   :  { %v153_v7 = vmul.f32 %v440_v6, %v151_v0  ;;  %v154_v8 = vmul.f32 %v396_v1, %v152_v5  ;;  %v442_v40 = vpop.eup %441 }
  0x98   :  { %v258_v42 = vmul.f32 %v442_v40, %v250_v39  ;;  %v444_v43 = vpop.eup %443 }
  0x99   :  { %v155_v9 = vmul.f32 %v397_v4, %v153_v7  ;;  %v257_v44 = vmul.f32 %v444_v43, %v249_v41  ;;  %v280_v4 = vstv %s381_s15 }
  0x9a   :  { %445 = vlog2.f32 %v258_v42 }
  0x9b   :  { %v156_v10 = vpack.c.bf16 %v155_v9, %v154_v8  ;;  %447 = vlog2.f32 %v257_v44 }
  0x9d   :  { %406 = vmatmul.mubr.msk.bf16.vlgmr.msra.gmra.mxu0 %vm172_vm1, %v156_v10 }
  0xa7   :  { %v446_v45 = vpop.eup %445 }
  0xa8   :  { %v262_v46 = vmul.f32 0.6931472, %v446_v45  ;;  %v448_v47 = vpop.eup %447 }
  0xa9   :  { %v260_v49 = vmul.f32 0.6931472, %v448_v47 }
  0xaa   :  { %v265_v50 = vadd.f32 %v263_v48, %v262_v46 }
  0xab   :  { %v264_v51 = vadd.f32 %v263_v48, %v260_v49 }
  0xac   :  { %v393_v52 = vmul.f32 10.0, %v265_v50 }
  0xad   :  { %v392_v53 = vmul.f32 10.0, %v264_v51 }
  0xae   :  { %v272_v54 = vmul.f32 1.442695, %v393_v52 }
  0xaf   :  { %v270_v55 = vmul.f32 1.442695, %v392_v53 }
  0xb0   :  { %449 = vpow2.f32 %v272_v54 }
  0xb1   :  { %451 = vpow2.f32 %v270_v55 }
  0xbd   :  { %v450_v56 = vpop.eup %449 }
  0xbe   :  { %v275_v57 = vadd.f32 1.0, %v450_v56  ;;  %v452_v58 = vpop.eup %451 }
  0xbf   :  { %v274_v59 = vadd.f32 1.0, %v452_v58 }
  0xc0   :  { %453 = vrcp.f32 %v275_v57 }
  0xc1   :  { %455 = vrcp.f32 %v274_v59 }
  0xcd   :  { %v454_v63 = vpop.eup %453 }
  0xce   :  { %v282_v6 = vmul.f32 %v454_v63, %v280_v4  ;;  %v456_v7 = vpop.eup %455 }
  0xcf   :  { %v281_v11 = vmul.f32 %v456_v7, %v280_v4 }
 0x15d   :  { %v210_v61 = vpop.f32.mrf.mxu0 }
 0x15e   :  { %v211_v0 = vadd.f32 %v387_v60, %v210_v61 }
 0x15f   :  { %v407_v62 = vpop.f32.mrf.mxu0 }
 0x160   :  { %v219_v8 = vmul.f32 0.01, %v211_v0  ;;  %vm217_vm3 = vcmp.ge.f32.partialorder %v211_v0, 0.0 }
 0x161   :  { %v213_v1 = vpop.f32.mrf.mxu0 }
 0x162   :  { %v214_v3 = vadd.f32 %v387_v60, %v213_v1  ;;  %v221_v15 = vsel %vm217_vm3, %v211_v0, %v219_v8 }
 0x163   :  { %v408_v5 = vpop.f32.mrf.mxu0  ;;  %v283_v16 = vmul.f32 %v281_v11, %v221_v15 }
 0x164   :  { %v220_v9 = vmul.f32 0.01, %v214_v3  ;;  %vm218_vm2 = vcmp.ge.f32.partialorder %v214_v3, 0.0 }
 0x166   :  { %v222_v10 = vsel %vm218_vm2, %v214_v3, %v220_v9 }
 0x167   :  { %v284_v14 = vmul.f32 %v282_v6, %v222_v10 }
 0x169   :  { %410 = vmatpush3.xpose.msra.mxu1 %v284_v14 }
 0x16a   :  { %411 = vmatprep.subr.mxu1 %v542_v2 }
 0x16d   :  { %412 = vmatpush3.xpose.msra.mxu1 %v283_v16 }
 0x170   :  { %414 = vmatmul.mubr.f32.vlgmr.msra.gmra.mxu1 %v285_v17 }
 0x230   :  { %v353_v19 = vpop.f32.mrf.mxu1 }
 0x231   :  { %v354_v20 = vadd.f32 %v353_v19, %v286_v18 }
 0x232   :  { %v415_v21 = vpop.f32.mrf.mxu1 }
 0x233   :  { %v358_v22 = vmul.f32 0.01, %v354_v20  ;;  %vm357_vm4 = vcmp.ge.f32.partialorder %v354_v20, 0.0 }
 0x235   :  { %v359_v23 = vsel %vm357_vm4, %v354_v20, %v358_v22 }
 0x236   :  { %361 = vst.msk [vmem:[#allocation10] sm:$0x1] %vm360_vm5, %v359_v23 }
 0x237   :  { %520 = shalt.err (!%p517_p5)
}
 0x238   :  { %371 = dma.vmem_to_hbm [thread:$0]  %s369_s21, 16, %s620_s6, [#allocation5]  }
 0x239   :  { %535 = dma.done.wait [#allocation5], 16  }
 0x23a   :  { %536 = vsyncadd [#allocation5], 4294967280 }
 0x23b   :  { %375 = vsyncpa [#allocation4], 1 }
 0x23c   :  { %376 = vsyncpa [#allocation9], 1 }
 0x23d   :  { %377 = vsyncpa [#allocation5], 1 }
 0x23e   :  { %378 = vsyncpa [#allocation6], 1 }

</bundles_post_ra>
